<compile_context>
chip_gen: v7x
topology: tpu7x:2x2x1
jax: 0.10.0
libtpu: 0.0.40
codegen_flags: <defaults>
</compile_context>

<pallas_src>
import functools
import math

import jax
import jax.numpy as jnp
from jax.experimental import pallas as pl
from jax.experimental.pallas import tpu as pltpu


# ------------------------------- the kernel ---------------------------------

def down_kernel(xe_ref, xo_ref, emb_ref,
                w1_ref, g1_ref, b1_ref, w2_ref, g2_ref, b2_ref,
                w3_ref, g3_ref, b3_ref, w4_ref, g4_ref, b4_ref,
                out_ref, *, L2):
    Cin, N = xe_ref.shape              # N = Bt * L2 (samples along lanes)
    Bt = N // L2                       # samples handled by this grid step
    Bfull = emb_ref.shape[1]           # emb is passed whole: (Cout, B)

    # ---- hoisted per-grid-step constants (JAX does not CSE iota) -----------
    if L2 & (L2 - 1) == 0:             # power-of-two fast path: shift / mask
        _sh = L2.bit_length() - 1
        seg_of = lambda idx: idx >> _sh
        pos_of = lambda idx: idx & (L2 - 1)
    else:
        seg_of = lambda idx: idx // L2
        pos_of = lambda idx: idx % L2

    lane = jax.lax.broadcasted_iota(jnp.int32, (1, N), 1)
    pos = pos_of(lane)                                  # position within sample
    mask_lft = pos >= 1                                 # x[l-1] tap valid
    mask_rgt = pos < (L2 - 1)                           # x[l+1] tap valid

    if Bt > 1:
        # (N, Bt) / (Bt, N) segment indicators for per-sample GroupNorm stats
        S = (seg_of(jax.lax.broadcasted_iota(jnp.int32, (N, Bt), 0)) ==
             jax.lax.broadcasted_iota(jnp.int32, (N, Bt), 1)
             ).astype(jnp.float32)
        S_T = (jax.lax.broadcasted_iota(jnp.int32, (Bt, N), 0) ==
               seg_of(jax.lax.broadcasted_iota(jnp.int32, (Bt, N), 1))
               ).astype(jnp.float32)

    # one-hot (B, N) selecting this step's samples out of the (Cout, B) emb
    # tile and broadcasting each over its L2-lane segment (one tiny matmul).
    first = pl.program_id(0) * Bt
    E = (jax.lax.broadcasted_iota(jnp.int32, (Bfull, N), 0) ==
         seg_of(jax.lax.broadcasted_iota(jnp.int32, (Bfull, N), 1)) + first
         ).astype(jnp.float32)

    def stack3(v):
        # (C, N) -> (3C, N): rows [x[l-1] | x[l] | x[l+1]], zero at sample
        # edges.  roll is circular over the whole lane axis; the per-sample
        # masks also kill any cross-sample leakage at segment boundaries.
        vm1 = jnp.where(mask_lft, pltpu.roll(v, shift=1, axis=1), 0.0)
        vp1 = jnp.where(mask_rgt, pltpu.roll(v, shift=N - 1, axis=1), 0.0)
        return jnp.concatenate([vm1, v, vp1], axis=0)

    def conv3(v, w_ref):
        # fused 3-tap conv = one MXU matmul (K = 3*C_in, N = Bt*L2)
        return jnp.dot(w_ref[...], stack3(v), preferred_element_type=jnp.float32)

    def gelu(v):
        # tanh-approx GELU: one EUP tanh + a few VPU ops (|err| ~3e-4 vs erf)
        c = 0.7978845608028654          # sqrt(2/pi)
        return 0.5 * v * (1.0 + jnp.tanh(c * (v + 0.044715 * v * v * v)))

    def groupnorm(v, g_ref, b_ref):
        # GroupNorm(num_groups=1): per-sample stats over its (C, L2) segment.
        # Stats kept in f32 (one-pass E[x^2]-E[x]^2 is fine at these scales).
        C = v.shape[0]
        rcp_n = 1.0 / (C * L2)
        if Bt == 1:
            mu = jnp.sum(v) * rcp_n
            var = jnp.sum(v * v) * rcp_n - mu * mu
            vn = (v - mu) * jax.lax.rsqrt(var + 1e-5)
        else:
            s1 = jnp.sum(jnp.dot(v, S, preferred_element_type=jnp.float32),
                         axis=0, keepdims=True)                       # (1, Bt)
            s2 = jnp.sum(jnp.dot(v * v, S, preferred_element_type=jnp.float32),
                         axis=0, keepdims=True)                       # (1, Bt)
            mu = s1 * rcp_n
            var = s2 * rcp_n - mu * mu
            inv = jax.lax.rsqrt(var + 1e-5)                           # (1, Bt)
            mu_lane = jnp.dot(mu, S_T, preferred_element_type=jnp.float32)
            inv_lane = jnp.dot(inv, S_T, preferred_element_type=jnp.float32)
            vn = (v - mu_lane) * inv_lane
        return vn * g_ref[...] + b_ref[...]              # (C, 1) affine columns

    # MaxPool1d(kernel=2, stride=2): even/odd operands deinterleaved in wrapper
    x = jnp.maximum(xe_ref[...], xo_ref[...])            # (Cin, N)

    # DoubleConv(in, in, residual=True)
    h = gelu(groupnorm(conv3(x, w1_ref), g1_ref, b1_ref))
    h = groupnorm(conv3(h, w2_ref), g2_ref, b2_ref)
    x1 = gelu(x + h)                                     # (Cin, N)

    # DoubleConv(in, out)  (mid = out)
    h = gelu(groupnorm(conv3(x1, w3_ref), g3_ref, b3_ref))
    h = groupnorm(conv3(h, w4_ref), g4_ref, b4_ref)      # (Cout, N)
    # Dropout(p=0.05): inference identity

    # + time embedding, broadcast over each sample's length segment
    out_ref[...] = h + jnp.dot(emb_ref[...], E, preferred_element_type=jnp.float32)


# ------------------------------- the wrapper ---------------------------------

def prepare_down_params(p):
    """One-time parameter preprocessing (hoisted out of the per-call path)."""
    def fuse_w(w):
        # (Cout, Cin, 3) -> (Cout, 3*Cin), tap-major blocks [k=0 | k=1 | k=2]
        co, ci, k = w.shape
        return jnp.transpose(w, (0, 2, 1)).reshape(co, k * ci)

    def col(v):                                          # (C,) -> (C, 1)
        return v[:, None]

    return {
        "w1": fuse_w(p["w1"]), "g1": col(p["g1"]), "b1": col(p["b1"]),
        "w2": fuse_w(p["w2"]), "g2": col(p["g2"]), "b2": col(p["b2"]),
        "w3": fuse_w(p["w3"]), "g3": col(p["g3"]), "b3": col(p["b3"]),
        "w4": fuse_w(p["w4"]), "g4": col(p["g4"]), "b4": col(p["b4"]),
        "wl": p["wl"], "bl": p["bl"],
    }


def down_pallas(x, t, fp, *, batch_tile=None):
    """x: (B, Cin, L) f32, t: (B, emb_dim) f32 -> (B, Cout, L//2) f32."""
    B, Cin, L = x.shape
    L2 = L // 2
    Cout = fp["w4"].shape[0]

    # grid >= 2 by default so both v7x TensorCores get work ("parallel" axis);
    # on 1-TC chips (v5e/v6e) pass batch_tile=B to amortize per-step overhead.
    if batch_tile is None:
        batch_tile = B if B < 2 else B // 2
    assert B % batch_tile == 0
    Bt = batch_tile
    N = Bt * L2

    # emb_layer (SiLU -> Linear) hoisted to one batched XLA matmul, lane-major
    ts = t * jax.nn.sigmoid(t)
    emb = (ts @ fp["wl"].T + fp["bl"]).T                 # (Cout, B)

    # lane-major MaxPool operands: samples concatenated along the lane axis
    xt = jnp.transpose(x, (1, 0, 2)).reshape(Cin, B, L2, 2)
    xe = xt[..., 0].reshape(Cin, B * L2)                 # x[:, :, 0::2]
    xo = xt[..., 1].reshape(Cin, B * L2)                 # x[:, :, 1::2]

    args = (xe, xo, emb,
            fp["w1"], fp["g1"], fp["b1"], fp["w2"], fp["g2"], fp["b2"],
            fp["w3"], fp["g3"], fp["b3"], fp["w4"], fp["g4"], fp["b4"])

    def tiled_lanes(rows):                               # per-batch-tile blocks
        return pl.BlockSpec((rows, N), lambda b: (0, b))

    def shared(shape):                                   # resident across steps
        nd = len(shape)
        return pl.BlockSpec(shape, lambda b, _nd=nd: (0,) * _nd)

    in_specs = ([tiled_lanes(Cin), tiled_lanes(Cin), shared(emb.shape)]
                + [shared(a.shape) for a in args[3:]])

    grid_spec = pltpu.PrefetchScalarGridSpec(
        num_scalar_prefetch=0,
        grid=(B // Bt,),
        in_specs=in_specs,
        out_specs=pl.BlockSpec((Cout, N), lambda b: (0, b)),
    )

    out_flat = pl.pallas_call(
        functools.partial(down_kernel, L2=L2),
        out_shape=jax.ShapeDtypeStruct((Cout, B * L2), jnp.float32),
        grid_spec=grid_spec,
        compiler_params=pltpu.CompilerParams(
            dimension_semantics=("parallel",)),          # batch tiles independent
    )(*args)

    # lane-major (Cout, B*L2) slab -> (B, Cout, L2)
    return jnp.transpose(out_flat.reshape(Cout, B, L2), (1, 0, 2))


# --------------------------- pure-JAX reference ------------------------------

def down_reference(x, t, p, *, gelu_mode="exact"):
    B, Cin, L = x.shape
    xm = jnp.max(x.reshape(B, Cin, L // 2, 2), axis=-1)

    def conv(v, w):
        return jax.lax.conv_general_dilated(
            v, w, window_strides=(1,), padding=((1, 1),),
            dimension_numbers=("NCH", "OIH", "NCH"))

    def gn(v, g, b):
        mu = jnp.mean(v, axis=(1, 2), keepdims=True)
        var = jnp.mean((v - mu) ** 2, axis=(1, 2), keepdims=True)
        return (v - mu) / jnp.sqrt(var + 1e-5) * g[None, :, None] + b[None, :, None]

    def gelu(v):
        if gelu_mode == "tanh":
            c = 0.7978845608028654
            return 0.5 * v * (1.0 + jnp.tanh(c * (v + 0.044715 * v * v * v)))
        return 0.5 * v * (1.0 + jax.lax.erf(v / math.sqrt(2.0)))

    h = gelu(gn(conv(xm, p["w1"]), p["g1"], p["b1"]))
    h = gn(conv(h, p["w2"]), p["g2"], p["b2"])
    x1 = gelu(xm + h)
    h = gelu(gn(conv(x1, p["w3"]), p["g3"], p["b3"]))
    h = gn(conv(h, p["w4"]), p["g4"], p["b4"])
    ts = t * jax.nn.sigmoid(t)
    emb = ts @ p["wl"].T + p["bl"]
    return h + emb[:, :, None]


# ----------------------------------- main ------------------------------------

if __name__ == "__main__":
    # Channel counts are multiples of 8 (f32 sublane alignment); L//2 = 128 so
    # every grid step's tiles are lane-dense.
    B, Cin, Cout, L, EMB = 2, 8, 16, 256, 32

    key = jax.random.PRNGKey(0)
    ks = jax.random.split(key, 16)

    params = {
        # DoubleConv(Cin, Cin, residual=True)
        "w1": 0.2 * jax.random.normal(ks[0], (Cin, Cin, 3), jnp.float32),
        "g1": 1.0 + 0.1 * jax.random.normal(ks[1], (Cin,), jnp.float32),
        "b1": 0.1 * jax.random.normal(ks[2], (Cin,), jnp.float32),
        "w2": 0.2 * jax.random.normal(ks[3], (Cin, Cin, 3), jnp.float32),
        "g2": 1.0 + 0.1 * jax.random.normal(ks[4], (Cin,), jnp.float32),
        "b2": 0.1 * jax.random.normal(ks[5], (Cin,), jnp.float32),
        # DoubleConv(Cin, Cout), mid = Cout
        "w3": 0.2 * jax.random.normal(ks[6], (Cout, Cin, 3), jnp.float32),
        "g3": 1.0 + 0.1 * jax.random.normal(ks[7], (Cout,), jnp.float32),
        "b3": 0.1 * jax.random.normal(ks[8], (Cout,), jnp.float32),
        "w4": 0.2 * jax.random.normal(ks[9], (Cout, Cout, 3), jnp.float32),
        "g4": 1.0 + 0.1 * jax.random.normal(ks[10], (Cout,), jnp.float32),
        "b4": 0.1 * jax.random.normal(ks[11], (Cout,), jnp.float32),
        # emb_layer Linear(EMB, Cout)
        "wl": 0.2 * jax.random.normal(ks[12], (Cout, EMB), jnp.float32),
        "bl": 0.1 * jax.random.normal(ks[13], (Cout,), jnp.float32),
    }

    x = jax.random.normal(ks[14], (B, Cin, L), jnp.float32)
    t = jax.random.normal(ks[15], (B, EMB), jnp.float32)

    fused = prepare_down_params(params)          # one-time, out of the call path
    down = jax.jit(down_pallas, static_argnames=("batch_tile",))

    out = jax.block_until_ready(down(x, t, fused))
    assert out.shape == (B, Cout, L // 2), out.shape

    # (a) apples-to-apples check (reference also uses tanh-GELU): isolates the
    #     Pallas kernel math from the GELU approximation.
    ref_tanh = jax.block_until_ready(down_reference(x, t, params, gelu_mode="tanh"))
    err_kernel = float(jnp.max(jnp.abs(out - ref_tanh)))
    assert err_kernel < 1e-3, f"kernel mismatch vs tanh reference: {err_kernel}"

    # (b) check vs the PyTorch-faithful exact-erf GELU reference; the looser
    #     bound covers the tanh-GELU approximation (~3e-4 per call, 6 calls).
    ref_exact = jax.block_until_ready(down_reference(x, t, params, gelu_mode="exact"))
    err_exact = float(jnp.max(jnp.abs(out - ref_exact)))
    assert err_exact < 1e-2, f"mismatch vs exact reference: {err_exact}"

    print("KERNEL_OK")
</pallas_src>

<mosaic_0001>
module attributes {stable_mosaic.version = 11 : i64} {
  func.func @down_kernel(%arg0: i32, %arg1: memref<8x128xf32, #tpu.memory_space<vmem>>, %arg2: memref<8x128xf32, #tpu.memory_space<vmem>>, %arg3: memref<16x2xf32, #tpu.memory_space<vmem>>, %arg4: memref<8x24xf32, #tpu.memory_space<vmem>>, %arg5: memref<8x1xf32, #tpu.memory_space<vmem>>, %arg6: memref<8x1xf32, #tpu.memory_space<vmem>>, %arg7: memref<8x24xf32, #tpu.memory_space<vmem>>, %arg8: memref<8x1xf32, #tpu.memory_space<vmem>>, %arg9: memref<8x1xf32, #tpu.memory_space<vmem>>, %arg10: memref<16x24xf32, #tpu.memory_space<vmem>>, %arg11: memref<16x1xf32, #tpu.memory_space<vmem>>, %arg12: memref<16x1xf32, #tpu.memory_space<vmem>>, %arg13: memref<16x48xf32, #tpu.memory_space<vmem>>, %arg14: memref<16x1xf32, #tpu.memory_space<vmem>>, %arg15: memref<16x1xf32, #tpu.memory_space<vmem>>, %arg16: memref<16x128xf32, #tpu.memory_space<vmem>>) attributes {dimension_semantics = [#tpu.dimension_semantics<parallel>], iteration_bounds = array<i64: 2>, scalar_prefetch = 0 : i64, scratch_operands = 0 : i64, tpu.core_type = #tpu.core_type<tc>, window_params = [{transform_indices = @transform_0, window_bounds = array<i64: 8, 128>}, {transform_indices = @transform_1, window_bounds = array<i64: 8, 128>}, {pipeline_mode = #tpu.pipeline_mode<synchronous>, transform_indices = @transform_2, window_bounds = array<i64: 16, 2>}, {pipeline_mode = #tpu.pipeline_mode<synchronous>, transform_indices = @transform_3, window_bounds = array<i64: 8, 24>}, {pipeline_mode = #tpu.pipeline_mode<synchronous>, transform_indices = @transform_4, window_bounds = array<i64: 8, 1>}, {pipeline_mode = #tpu.pipeline_mode<synchronous>, transform_indices = @transform_5, window_bounds = array<i64: 8, 1>}, {pipeline_mode = #tpu.pipeline_mode<synchronous>, transform_indices = @transform_6, window_bounds = array<i64: 8, 24>}, {pipeline_mode = #tpu.pipeline_mode<synchronous>, transform_indices = @transform_7, window_bounds = array<i64: 8, 1>}, {pipeline_mode = #tpu.pipeline_mode<synchronous>, transform_indices = @transform_8, window_bounds = array<i64: 8, 1>}, {pipeline_mode = #tpu.pipeline_mode<synchronous>, transform_indices = @transform_9, window_bounds = array<i64: 16, 24>}, {pipeline_mode = #tpu.pipeline_mode<synchronous>, transform_indices = @transform_10, window_bounds = array<i64: 16, 1>}, {pipeline_mode = #tpu.pipeline_mode<synchronous>, transform_indices = @transform_11, window_bounds = array<i64: 16, 1>}, {pipeline_mode = #tpu.pipeline_mode<synchronous>, transform_indices = @transform_12, window_bounds = array<i64: 16, 48>}, {pipeline_mode = #tpu.pipeline_mode<synchronous>, transform_indices = @transform_13, window_bounds = array<i64: 16, 1>}, {pipeline_mode = #tpu.pipeline_mode<synchronous>, transform_indices = @transform_14, window_bounds = array<i64: 16, 1>}, {transform_indices = @transform_15, window_bounds = array<i64: 16, 128>}]} {
    %0 = tpu.iota {dimensions = array<i32: 1>} : vector<1x128xi32>
    %c127_i32 = arith.constant 127 : i32
    %1 = vector.broadcast %c127_i32 : i32 to vector<1x128xi32>
    %2 = arith.andi %0, %1 : vector<1x128xi32>
    %c1_i32 = arith.constant 1 : i32
    %3 = vector.broadcast %c1_i32 : i32 to vector<1x128xi32>
    %4 = arith.cmpi sge, %2, %3 : vector<1x128xi32>
    %c127_i32_0 = arith.constant 127 : i32
    %5 = vector.broadcast %c127_i32_0 : i32 to vector<1x128xi32>
    %6 = arith.cmpi slt, %2, %5 : vector<1x128xi32>
    %c1_i32_1 = arith.constant 1 : i32
    %7 = arith.muli %arg0, %c1_i32_1 : i32
    %8 = tpu.iota {dimensions = array<i32: 0>} : vector<2x128xi32>
    %9 = tpu.iota {dimensions = array<i32: 1>} : vector<2x128xi32>
    %c7_i32 = arith.constant 7 : i32
    %10 = vector.broadcast %c7_i32 : i32 to vector<2x128xi32>
    %11 = arith.shrsi %9, %10 : vector<2x128xi32>
    %12 = vector.broadcast %7 : i32 to vector<2x128xi32>
    %13 = arith.addi %11, %12 : vector<2x128xi32>
    %14 = arith.cmpi eq, %8, %13 : vector<2x128xi32>
    %15 = arith.extui %14 : vector<2x128xi1> to vector<2x128xi32>
    %16 = arith.sitofp %15 : vector<2x128xi32> to vector<2x128xf32>
    %c0 = arith.constant 0 : index
    %c0_2 = arith.constant 0 : index
    %17 = vector.load %arg1[%c0, %c0_2] : memref<8x128xf32, #tpu.memory_space<vmem>>, vector<8x128xf32>
    %c0_3 = arith.constant 0 : index
    %c0_4 = arith.constant 0 : index
    %18 = vector.load %arg2[%c0_3, %c0_4] : memref<8x128xf32, #tpu.memory_space<vmem>>, vector<8x128xf32>
    %19 = arith.maximumf %17, %18 : vector<8x128xf32>
    %c0_5 = arith.constant 0 : index
    %c0_6 = arith.constant 0 : index
    %20 = vector.load %arg4[%c0_5, %c0_6] : memref<8x24xf32, #tpu.memory_space<vmem>>, vector<8x24xf32>
    %c1_i32_7 = arith.constant 1 : i32
    %21 = tpu.dynamic_rotate %19 by %c1_i32_7 dim 1 : vector<8x128xf32>, i32 -> vector<8x128xf32>
    %cst = arith.constant 0.000000e+00 : f32
    %22 = vector.shape_cast %4 : vector<1x128xi1> to vector<1x128xi1>
    %23 = vector.broadcast %22 : vector<1x128xi1> to vector<8x128xi1>
    %24 = vector.broadcast %cst : f32 to vector<8x128xf32>
    %25 = arith.select %23, %21, %24 : vector<8x128xi1>, vector<8x128xf32>
    %c127_i32_8 = arith.constant 127 : i32
    %26 = tpu.dynamic_rotate %19 by %c127_i32_8 dim 1 : vector<8x128xf32>, i32 -> vector<8x128xf32>
    %cst_9 = arith.constant 0.000000e+00 : f32
    %27 = vector.shape_cast %6 : vector<1x128xi1> to vector<1x128xi1>
    %28 = vector.broadcast %27 : vector<1x128xi1> to vector<8x128xi1>
    %29 = vector.broadcast %cst_9 : f32 to vector<8x128xf32>
    %30 = arith.select %28, %26, %29 : vector<8x128xi1>, vector<8x128xf32>
    %31 = tpu.concatenate %25, %19, %30 in 0 : vector<8x128xf32>, vector<8x128xf32>, vector<8x128xf32> -> vector<24x128xf32>
    %cst_10 = arith.constant dense<0.000000e+00> : vector<8x128xf32>
    %32 = tpu.matmul %20, %31, %cst_10 {dimension_numbers = #tpu.dot_dimension_numbers<[1], [0], [0], [1], [0, 0, 1, 1], [], []>} : vector<8x24xf32>, vector<24x128xf32>, vector<8x128xf32> -> vector<8x128xf32>
    %33 = vector.shape_cast %32 : vector<8x128xf32> to vector<1x8x128xf32>
    %cst_11 = arith.constant dense<0.000000e+00> : vector<1xf32>
    %34 = vector.multi_reduction <add>, %33, %cst_11 [1, 2] : vector<1x8x128xf32> to vector<1xf32>
    %35 = vector.shape_cast %34 : vector<1xf32> to vector<1x1x1xf32>
    %36 = vector.extract %35[0, 0, 0] : f32 from vector<1x1x1xf32>
    %cst_12 = arith.constant 9.765625E-4 : f32
    %37 = arith.mulf %36, %cst_12 : f32
    %38 = arith.mulf %32, %32 : vector<8x128xf32>
    %39 = vector.shape_cast %38 : vector<8x128xf32> to vector<1x8x128xf32>
    %cst_13 = arith.constant dense<0.000000e+00> : vector<1xf32>
    %40 = vector.multi_reduction <add>, %39, %cst_13 [1, 2] : vector<1x8x128xf32> to vector<1xf32>
    %41 = vector.shape_cast %40 : vector<1xf32> to vector<1x1x1xf32>
    %42 = vector.extract %41[0, 0, 0] : f32 from vector<1x1x1xf32>
    %cst_14 = arith.constant 9.765625E-4 : f32
    %43 = arith.mulf %42, %cst_14 : f32
    %44 = arith.mulf %37, %37 : f32
    %45 = arith.subf %43, %44 : f32
    %46 = vector.broadcast %37 : f32 to vector<8x128xf32>
    %47 = arith.subf %32, %46 : vector<8x128xf32>
    %cst_15 = arith.constant 9.99999974E-6 : f32
    %48 = arith.addf %45, %cst_15 : f32
    %49 = math.rsqrt %48 : f32
    %50 = vector.broadcast %49 : f32 to vector<8x128xf32>
    %51 = arith.mulf %47, %50 : vector<8x128xf32>
    %c0_16 = arith.constant 0 : index
    %c0_17 = arith.constant 0 : index
    %52 = vector.load %arg5[%c0_16, %c0_17] : memref<8x1xf32, #tpu.memory_space<vmem>>, vector<8x1xf32>
    %53 = vector.broadcast %52 : vector<8x1xf32> to vector<8x128xf32>
    %54 = arith.mulf %51, %53 : vector<8x128xf32>
    %c0_18 = arith.constant 0 : index
    %c0_19 = arith.constant 0 : index
    %55 = vector.load %arg6[%c0_18, %c0_19] : memref<8x1xf32, #tpu.memory_space<vmem>>, vector<8x1xf32>
    %56 = vector.broadcast %55 : vector<8x1xf32> to vector<8x128xf32>
    %57 = arith.addf %54, %56 : vector<8x128xf32>
    %cst_20 = arith.constant 5.000000e-01 : f32
    %58 = vector.broadcast %cst_20 : f32 to vector<8x128xf32>
    %59 = arith.mulf %58, %57 : vector<8x128xf32>
    %cst_21 = arith.constant 4.471500e-02 : f32
    %60 = vector.broadcast %cst_21 : f32 to vector<8x128xf32>
    %61 = arith.mulf %60, %57 : vector<8x128xf32>
    %62 = arith.mulf %61, %57 : vector<8x128xf32>
    %63 = arith.mulf %62, %57 : vector<8x128xf32>
    %64 = arith.addf %57, %63 : vector<8x128xf32>
    %cst_22 = arith.constant 0.797884583 : f32
    %65 = vector.broadcast %cst_22 : f32 to vector<8x128xf32>
    %66 = arith.mulf %65, %64 : vector<8x128xf32>
    %67 = math.tanh %66 : vector<8x128xf32>
    %cst_23 = arith.constant 1.000000e+00 : f32
    %68 = vector.broadcast %cst_23 : f32 to vector<8x128xf32>
    %69 = arith.addf %68, %67 : vector<8x128xf32>
    %70 = arith.mulf %59, %69 : vector<8x128xf32>
    %c0_24 = arith.constant 0 : index
    %c0_25 = arith.constant 0 : index
    %71 = vector.load %arg7[%c0_24, %c0_25] : memref<8x24xf32, #tpu.memory_space<vmem>>, vector<8x24xf32>
    %c1_i32_26 = arith.constant 1 : i32
    %72 = tpu.dynamic_rotate %70 by %c1_i32_26 dim 1 : vector<8x128xf32>, i32 -> vector<8x128xf32>
    %cst_27 = arith.constant 0.000000e+00 : f32
    %73 = vector.shape_cast %4 : vector<1x128xi1> to vector<1x128xi1>
    %74 = vector.broadcast %73 : vector<1x128xi1> to vector<8x128xi1>
    %75 = vector.broadcast %cst_27 : f32 to vector<8x128xf32>
    %76 = arith.select %74, %72, %75 : vector<8x128xi1>, vector<8x128xf32>
    %c127_i32_28 = arith.constant 127 : i32
    %77 = tpu.dynamic_rotate %70 by %c127_i32_28 dim 1 : vector<8x128xf32>, i32 -> vector<8x128xf32>
    %cst_29 = arith.constant 0.000000e+00 : f32
    %78 = vector.shape_cast %6 : vector<1x128xi1> to vector<1x128xi1>
    %79 = vector.broadcast %78 : vector<1x128xi1> to vector<8x128xi1>
    %80 = vector.broadcast %cst_29 : f32 to vector<8x128xf32>
    %81 = arith.select %79, %77, %80 : vector<8x128xi1>, vector<8x128xf32>
    %82 = tpu.concatenate %76, %70, %81 in 0 : vector<8x128xf32>, vector<8x128xf32>, vector<8x128xf32> -> vector<24x128xf32>
    %cst_30 = arith.constant dense<0.000000e+00> : vector<8x128xf32>
    %83 = tpu.matmul %71, %82, %cst_30 {dimension_numbers = #tpu.dot_dimension_numbers<[1], [0], [0], [1], [0, 0, 1, 1], [], []>} : vector<8x24xf32>, vector<24x128xf32>, vector<8x128xf32> -> vector<8x128xf32>
    %84 = vector.shape_cast %83 : vector<8x128xf32> to vector<1x8x128xf32>
    %cst_31 = arith.constant dense<0.000000e+00> : vector<1xf32>
    %85 = vector.multi_reduction <add>, %84, %cst_31 [1, 2] : vector<1x8x128xf32> to vector<1xf32>
    %86 = vector.shape_cast %85 : vector<1xf32> to vector<1x1x1xf32>
    %87 = vector.extract %86[0, 0, 0] : f32 from vector<1x1x1xf32>
    %cst_32 = arith.constant 9.765625E-4 : f32
    %88 = arith.mulf %87, %cst_32 : f32
    %89 = arith.mulf %83, %83 : vector<8x128xf32>
    %90 = vector.shape_cast %89 : vector<8x128xf32> to vector<1x8x128xf32>
    %cst_33 = arith.constant dense<0.000000e+00> : vector<1xf32>
    %91 = vector.multi_reduction <add>, %90, %cst_33 [1, 2] : vector<1x8x128xf32> to vector<1xf32>
    %92 = vector.shape_cast %91 : vector<1xf32> to vector<1x1x1xf32>
    %93 = vector.extract %92[0, 0, 0] : f32 from vector<1x1x1xf32>
    %cst_34 = arith.constant 9.765625E-4 : f32
    %94 = arith.mulf %93, %cst_34 : f32
    %95 = arith.mulf %88, %88 : f32
    %96 = arith.subf %94, %95 : f32
    %97 = vector.broadcast %88 : f32 to vector<8x128xf32>
    %98 = arith.subf %83, %97 : vector<8x128xf32>
    %cst_35 = arith.constant 9.99999974E-6 : f32
    %99 = arith.addf %96, %cst_35 : f32
    %100 = math.rsqrt %99 : f32
    %101 = vector.broadcast %100 : f32 to vector<8x128xf32>
    %102 = arith.mulf %98, %101 : vector<8x128xf32>
    %c0_36 = arith.constant 0 : index
    %c0_37 = arith.constant 0 : index
    %103 = vector.load %arg8[%c0_36, %c0_37] : memref<8x1xf32, #tpu.memory_space<vmem>>, vector<8x1xf32>
    %104 = vector.broadcast %103 : vector<8x1xf32> to vector<8x128xf32>
    %105 = arith.mulf %102, %104 : vector<8x128xf32>
    %c0_38 = arith.constant 0 : index
    %c0_39 = arith.constant 0 : index
    %106 = vector.load %arg9[%c0_38, %c0_39] : memref<8x1xf32, #tpu.memory_space<vmem>>, vector<8x1xf32>
    %107 = vector.broadcast %106 : vector<8x1xf32> to vector<8x128xf32>
    %108 = arith.addf %105, %107 : vector<8x128xf32>
    %109 = arith.addf %19, %108 : vector<8x128xf32>
    %cst_40 = arith.constant 5.000000e-01 : f32
    %110 = vector.broadcast %cst_40 : f32 to vector<8x128xf32>
    %111 = arith.mulf %110, %109 : vector<8x128xf32>
    %cst_41 = arith.constant 4.471500e-02 : f32
    %112 = vector.broadcast %cst_41 : f32 to vector<8x128xf32>
    %113 = arith.mulf %112, %109 : vector<8x128xf32>
    %114 = arith.mulf %113, %109 : vector<8x128xf32>
    %115 = arith.mulf %114, %109 : vector<8x128xf32>
    %116 = arith.addf %109, %115 : vector<8x128xf32>
    %cst_42 = arith.constant 0.797884583 : f32
    %117 = vector.broadcast %cst_42 : f32 to vector<8x128xf32>
    %118 = arith.mulf %117, %116 : vector<8x128xf32>
    %119 = math.tanh %118 : vector<8x128xf32>
    %cst_43 = arith.constant 1.000000e+00 : f32
    %120 = vector.broadcast %cst_43 : f32 to vector<8x128xf32>
    %121 = arith.addf %120, %119 : vector<8x128xf32>
    %122 = arith.mulf %111, %121 : vector<8x128xf32>
    %c0_44 = arith.constant 0 : index
    %c0_45 = arith.constant 0 : index
    %123 = vector.load %arg10[%c0_44, %c0_45] : memref<16x24xf32, #tpu.memory_space<vmem>>, vector<16x24xf32>
    %c1_i32_46 = arith.constant 1 : i32
    %124 = tpu.dynamic_rotate %122 by %c1_i32_46 dim 1 : vector<8x128xf32>, i32 -> vector<8x128xf32>
    %cst_47 = arith.constant 0.000000e+00 : f32
    %125 = vector.shape_cast %4 : vector<1x128xi1> to vector<1x128xi1>
    %126 = vector.broadcast %125 : vector<1x128xi1> to vector<8x128xi1>
    %127 = vector.broadcast %cst_47 : f32 to vector<8x128xf32>
    %128 = arith.select %126, %124, %127 : vector<8x128xi1>, vector<8x128xf32>
    %c127_i32_48 = arith.constant 127 : i32
    %129 = tpu.dynamic_rotate %122 by %c127_i32_48 dim 1 : vector<8x128xf32>, i32 -> vector<8x128xf32>
    %cst_49 = arith.constant 0.000000e+00 : f32
    %130 = vector.shape_cast %6 : vector<1x128xi1> to vector<1x128xi1>
    %131 = vector.broadcast %130 : vector<1x128xi1> to vector<8x128xi1>
    %132 = vector.broadcast %cst_49 : f32 to vector<8x128xf32>
    %133 = arith.select %131, %129, %132 : vector<8x128xi1>, vector<8x128xf32>
    %134 = tpu.concatenate %128, %122, %133 in 0 : vector<8x128xf32>, vector<8x128xf32>, vector<8x128xf32> -> vector<24x128xf32>
    %cst_50 = arith.constant dense<0.000000e+00> : vector<16x128xf32>
    %135 = tpu.matmul %123, %134, %cst_50 {dimension_numbers = #tpu.dot_dimension_numbers<[1], [0], [0], [1], [0, 0, 1, 1], [], []>} : vector<16x24xf32>, vector<24x128xf32>, vector<16x128xf32> -> vector<16x128xf32>
    %136 = vector.shape_cast %135 : vector<16x128xf32> to vector<1x16x128xf32>
    %cst_51 = arith.constant dense<0.000000e+00> : vector<1xf32>
    %137 = vector.multi_reduction <add>, %136, %cst_51 [1, 2] : vector<1x16x128xf32> to vector<1xf32>
    %138 = vector.shape_cast %137 : vector<1xf32> to vector<1x1x1xf32>
    %139 = vector.extract %138[0, 0, 0] : f32 from vector<1x1x1xf32>
    %cst_52 = arith.constant 4.8828125E-4 : f32
    %140 = arith.mulf %139, %cst_52 : f32
    %141 = arith.mulf %135, %135 : vector<16x128xf32>
    %142 = vector.shape_cast %141 : vector<16x128xf32> to vector<1x16x128xf32>
    %cst_53 = arith.constant dense<0.000000e+00> : vector<1xf32>
    %143 = vector.multi_reduction <add>, %142, %cst_53 [1, 2] : vector<1x16x128xf32> to vector<1xf32>
    %144 = vector.shape_cast %143 : vector<1xf32> to vector<1x1x1xf32>
    %145 = vector.extract %144[0, 0, 0] : f32 from vector<1x1x1xf32>
    %cst_54 = arith.constant 4.8828125E-4 : f32
    %146 = arith.mulf %145, %cst_54 : f32
    %147 = arith.mulf %140, %140 : f32
    %148 = arith.subf %146, %147 : f32
    %149 = vector.broadcast %140 : f32 to vector<16x128xf32>
    %150 = arith.subf %135, %149 : vector<16x128xf32>
    %cst_55 = arith.constant 9.99999974E-6 : f32
    %151 = arith.addf %148, %cst_55 : f32
    %152 = math.rsqrt %151 : f32
    %153 = vector.broadcast %152 : f32 to vector<16x128xf32>
    %154 = arith.mulf %150, %153 : vector<16x128xf32>
    %c0_56 = arith.constant 0 : index
    %c0_57 = arith.constant 0 : index
    %155 = vector.load %arg11[%c0_56, %c0_57] : memref<16x1xf32, #tpu.memory_space<vmem>>, vector<16x1xf32>
    %156 = vector.broadcast %155 : vector<16x1xf32> to vector<16x128xf32>
    %157 = arith.mulf %154, %156 : vector<16x128xf32>
    %c0_58 = arith.constant 0 : index
    %c0_59 = arith.constant 0 : index
    %158 = vector.load %arg12[%c0_58, %c0_59] : memref<16x1xf32, #tpu.memory_space<vmem>>, vector<16x1xf32>
    %159 = vector.broadcast %158 : vector<16x1xf32> to vector<16x128xf32>
    %160 = arith.addf %157, %159 : vector<16x128xf32>
    %cst_60 = arith.constant 5.000000e-01 : f32
    %161 = vector.broadcast %cst_60 : f32 to vector<16x128xf32>
    %162 = arith.mulf %161, %160 : vector<16x128xf32>
    %cst_61 = arith.constant 4.471500e-02 : f32
    %163 = vector.broadcast %cst_61 : f32 to vector<16x128xf32>
    %164 = arith.mulf %163, %160 : vector<16x128xf32>
    %165 = arith.mulf %164, %160 : vector<16x128xf32>
    %166 = arith.mulf %165, %160 : vector<16x128xf32>
    %167 = arith.addf %160, %166 : vector<16x128xf32>
    %cst_62 = arith.constant 0.797884583 : f32
    %168 = vector.broadcast %cst_62 : f32 to vector<16x128xf32>
    %169 = arith.mulf %168, %167 : vector<16x128xf32>
    %170 = math.tanh %169 : vector<16x128xf32>
    %cst_63 = arith.constant 1.000000e+00 : f32
    %171 = vector.broadcast %cst_63 : f32 to vector<16x128xf32>
    %172 = arith.addf %171, %170 : vector<16x128xf32>
    %173 = arith.mulf %162, %172 : vector<16x128xf32>
    %c0_64 = arith.constant 0 : index
    %c0_65 = arith.constant 0 : index
    %174 = vector.load %arg13[%c0_64, %c0_65] : memref<16x48xf32, #tpu.memory_space<vmem>>, vector<16x48xf32>
    %c1_i32_66 = arith.constant 1 : i32
    %175 = tpu.dynamic_rotate %173 by %c1_i32_66 dim 1 : vector<16x128xf32>, i32 -> vector<16x128xf32>
    %cst_67 = arith.constant 0.000000e+00 : f32
    %176 = vector.shape_cast %4 : vector<1x128xi1> to vector<1x128xi1>
    %177 = vector.broadcast %176 : vector<1x128xi1> to vector<16x128xi1>
    %178 = vector.broadcast %cst_67 : f32 to vector<16x128xf32>
    %179 = arith.select %177, %175, %178 : vector<16x128xi1>, vector<16x128xf32>
    %c127_i32_68 = arith.constant 127 : i32
    %180 = tpu.dynamic_rotate %173 by %c127_i32_68 dim 1 : vector<16x128xf32>, i32 -> vector<16x128xf32>
    %cst_69 = arith.constant 0.000000e+00 : f32
    %181 = vector.shape_cast %6 : vector<1x128xi1> to vector<1x128xi1>
    %182 = vector.broadcast %181 : vector<1x128xi1> to vector<16x128xi1>
    %183 = vector.broadcast %cst_69 : f32 to vector<16x128xf32>
    %184 = arith.select %182, %180, %183 : vector<16x128xi1>, vector<16x128xf32>
    %185 = tpu.concatenate %179, %173, %184 in 0 : vector<16x128xf32>, vector<16x128xf32>, vector<16x128xf32> -> vector<48x128xf32>
    %cst_70 = arith.constant dense<0.000000e+00> : vector<16x128xf32>
    %186 = tpu.matmul %174, %185, %cst_70 {dimension_numbers = #tpu.dot_dimension_numbers<[1], [0], [0], [1], [0, 0, 1, 1], [], []>} : vector<16x48xf32>, vector<48x128xf32>, vector<16x128xf32> -> vector<16x128xf32>
    %187 = vector.shape_cast %186 : vector<16x128xf32> to vector<1x16x128xf32>
    %cst_71 = arith.constant dense<0.000000e+00> : vector<1xf32>
    %188 = vector.multi_reduction <add>, %187, %cst_71 [1, 2] : vector<1x16x128xf32> to vector<1xf32>
    %189 = vector.shape_cast %188 : vector<1xf32> to vector<1x1x1xf32>
    %190 = vector.extract %189[0, 0, 0] : f32 from vector<1x1x1xf32>
    %cst_72 = arith.constant 4.8828125E-4 : f32
    %191 = arith.mulf %190, %cst_72 : f32
    %192 = arith.mulf %186, %186 : vector<16x128xf32>
    %193 = vector.shape_cast %192 : vector<16x128xf32> to vector<1x16x128xf32>
    %cst_73 = arith.constant dense<0.000000e+00> : vector<1xf32>
    %194 = vector.multi_reduction <add>, %193, %cst_73 [1, 2] : vector<1x16x128xf32> to vector<1xf32>
    %195 = vector.shape_cast %194 : vector<1xf32> to vector<1x1x1xf32>
    %196 = vector.extract %195[0, 0, 0] : f32 from vector<1x1x1xf32>
    %cst_74 = arith.constant 4.8828125E-4 : f32
    %197 = arith.mulf %196, %cst_74 : f32
    %198 = arith.mulf %191, %191 : f32
    %199 = arith.subf %197, %198 : f32
    %200 = vector.broadcast %191 : f32 to vector<16x128xf32>
    %201 = arith.subf %186, %200 : vector<16x128xf32>
    %cst_75 = arith.constant 9.99999974E-6 : f32
    %202 = arith.addf %199, %cst_75 : f32
    %203 = math.rsqrt %202 : f32
    %204 = vector.broadcast %203 : f32 to vector<16x128xf32>
    %205 = arith.mulf %201, %204 : vector<16x128xf32>
    %c0_76 = arith.constant 0 : index
    %c0_77 = arith.constant 0 : index
    %206 = vector.load %arg14[%c0_76, %c0_77] : memref<16x1xf32, #tpu.memory_space<vmem>>, vector<16x1xf32>
    %207 = vector.broadcast %206 : vector<16x1xf32> to vector<16x128xf32>
    %208 = arith.mulf %205, %207 : vector<16x128xf32>
    %c0_78 = arith.constant 0 : index
    %c0_79 = arith.constant 0 : index
    %209 = vector.load %arg15[%c0_78, %c0_79] : memref<16x1xf32, #tpu.memory_space<vmem>>, vector<16x1xf32>
    %210 = vector.broadcast %209 : vector<16x1xf32> to vector<16x128xf32>
    %211 = arith.addf %208, %210 : vector<16x128xf32>
    %c0_80 = arith.constant 0 : index
    %c0_81 = arith.constant 0 : index
    %212 = vector.load %arg3[%c0_80, %c0_81] : memref<16x2xf32, #tpu.memory_space<vmem>>, vector<16x2xf32>
    %cst_82 = arith.constant dense<0.000000e+00> : vector<16x128xf32>
    %213 = tpu.matmul %212, %16, %cst_82 {dimension_numbers = #tpu.dot_dimension_numbers<[1], [0], [0], [1], [0, 0, 1, 1], [], []>} : vector<16x2xf32>, vector<2x128xf32>, vector<16x128xf32> -> vector<16x128xf32>
    %214 = arith.addf %211, %213 : vector<16x128xf32>
    %c0_83 = arith.constant 0 : index
    %c0_84 = arith.constant 0 : index
    %215 = vector.load %arg16[%c0_83, %c0_84] : memref<16x128xf32, #tpu.memory_space<vmem>>, vector<16x128xf32>
    tpu.vector_store %arg16[%c0_83, %c0_84], %214 {strides = array<i32>} : memref<16x128xf32, #tpu.memory_space<vmem>>, vector<16x128xf32>,
    return
  }
  func.func @transform_0(%arg0: i32) -> (i32, i32) {
    %c0_i32 = arith.constant 0 : i32
    %c0_i32_0 = arith.constant 0 : i32
    return %c0_i32, %arg0 : i32, i32
  }
  func.func @transform_1(%arg0: i32) -> (i32, i32) {
    %c0_i32 = arith.constant 0 : i32
    %c0_i32_0 = arith.constant 0 : i32
    return %c0_i32, %arg0 : i32, i32
  }
  func.func @transform_2(%arg0: i32) -> (i32, i32) {
    %c0_i32 = arith.constant 0 : i32
    %c0_i32_0 = arith.constant 0 : i32
    %c0_i32_1 = arith.constant 0 : i32
    return %c0_i32, %c0_i32_0 : i32, i32
  }
  func.func @transform_3(%arg0: i32) -> (i32, i32) {
    %c0_i32 = arith.constant 0 : i32
    %c0_i32_0 = arith.constant 0 : i32
    %c0_i32_1 = arith.constant 0 : i32
    return %c0_i32, %c0_i32_0 : i32, i32
  }
  func.func @transform_4(%arg0: i32) -> (i32, i32) {
    %c0_i32 = arith.constant 0 : i32
    %c0_i32_0 = arith.constant 0 : i32
    %c0_i32_1 = arith.constant 0 : i32
    return %c0_i32, %c0_i32_0 : i32, i32
  }
  func.func @transform_5(%arg0: i32) -> (i32, i32) {
    %c0_i32 = arith.constant 0 : i32
    %c0_i32_0 = arith.constant 0 : i32
    %c0_i32_1 = arith.constant 0 : i32
    return %c0_i32, %c0_i32_0 : i32, i32
  }
  func.func @transform_6(%arg0: i32) -> (i32, i32) {
    %c0_i32 = arith.constant 0 : i32
    %c0_i32_0 = arith.constant 0 : i32
    %c0_i32_1 = arith.constant 0 : i32
    return %c0_i32, %c0_i32_0 : i32, i32
  }
  func.func @transform_7(%arg0: i32) -> (i32, i32) {
    %c0_i32 = arith.constant 0 : i32
    %c0_i32_0 = arith.constant 0 : i32
    %c0_i32_1 = arith.constant 0 : i32
    return %c0_i32, %c0_i32_0 : i32, i32
  }
  func.func @transform_8(%arg0: i32) -> (i32, i32) {
    %c0_i32 = arith.constant 0 : i32
    %c0_i32_0 = arith.constant 0 : i32
    %c0_i32_1 = arith.constant 0 : i32
    return %c0_i32, %c0_i32_0 : i32, i32
  }
  func.func @transform_9(%arg0: i32) -> (i32, i32) {
    %c0_i32 = arith.constant 0 : i32
    %c0_i32_0 = arith.constant 0 : i32
    %c0_i32_1 = arith.constant 0 : i32
    return %c0_i32, %c0_i32_0 : i32, i32
  }
  func.func @transform_10(%arg0: i32) -> (i32, i32) {
    %c0_i32 = arith.constant 0 : i32
    %c0_i32_0 = arith.constant 0 : i32
    %c0_i32_1 = arith.constant 0 : i32
    return %c0_i32, %c0_i32_0 : i32, i32
  }
  func.func @transform_11(%arg0: i32) -> (i32, i32) {
    %c0_i32 = arith.constant 0 : i32
    %c0_i32_0 = arith.constant 0 : i32
    %c0_i32_1 = arith.constant 0 : i32
    return %c0_i32, %c0_i32_0 : i32, i32
  }
  func.func @transform_12(%arg0: i32) -> (i32, i32) {
    %c0_i32 = arith.constant 0 : i32
    %c0_i32_0 = arith.constant 0 : i32
    %c0_i32_1 = arith.constant 0 : i32
    return %c0_i32, %c0_i32_0 : i32, i32
  }
  func.func @transform_13(%arg0: i32) -> (i32, i32) {
    %c0_i32 = arith.constant 0 : i32
    %c0_i32_0 = arith.constant 0 : i32
    %c0_i32_1 = arith.constant 0 : i32
    return %c0_i32, %c0_i32_0 : i32, i32
  }
  func.func @transform_14(%arg0: i32) -> (i32, i32) {
    %c0_i32 = arith.constant 0 : i32
    %c0_i32_0 = arith.constant 0 : i32
    %c0_i32_1 = arith.constant 0 : i32
    return %c0_i32, %c0_i32_0 : i32, i32
  }
  func.func @transform_15(%arg0: i32) -> (i32, i32) {
    %c0_i32 = arith.constant 0 : i32
    %c0_i32_0 = arith.constant 0 : i32
    return %c0_i32, %arg0 : i32, i32
  }
}

</mosaic_0001>

<bundles_post_ra>
// kernel: down_pallas.1
= control target key start
LH: loop header
LB: loop body
LE: loop exit
PB: predicated region body
PF: predicated region fallthrough
CT: control target
= control target key end

     0   :  { %s1650_s18 = smov 0   ;;  %s1652_s19 = smov 0   ;;  %s1825_s0 = inlined_call_operand.vmem [shape: f32[8,256], index: 0, kind: input, shape index: {}]   ;;  %s1826_s1 = inlined_call_operand.vmem [shape: f32[8,256], index: 1, kind: input, shape index: {}]   ;;  %s1827_s2 = inlined_call_operand.vmem [shape: f32[16,2], index: 2, kind: input, shape index: {}]   ;;  %s1828_s3 = inlined_call_operand.vmem [shape: f32[8,24], index: 3, kind: input, shape index: {}]   ;;  %s1829_s4 = inlined_call_operand.vmem [shape: f32[8,1], index: 4, kind: input, shape index: {}]   ;;  %s1830_s5 = inlined_call_operand.vmem [shape: f32[8,1], index: 5, kind: input, shape index: {}]   ;;  %s1831_s6 = inlined_call_operand.vmem [shape: f32[8,24], index: 6, kind: input, shape index: {}]   ;;  %s1832_s7 = inlined_call_operand.vmem [shape: f32[8,1], index: 7, kind: input, shape index: {}]   ;;  %s1833_s8 = inlined_call_operand.vmem [shape: f32[8,1], index: 8, kind: input, shape index: {}]   ;;  %s1834_s9 = inlined_call_operand.vmem [shape: f32[16,24], index: 9, kind: input, shape index: {}]   ;;  %s1835_s10 = inlined_call_operand.vmem [shape: f32[16,1], index: 10, kind: input, shape index: {}]   ;;  %s1836_s11 = inlined_call_operand.vmem [shape: f32[16,1], index: 11, kind: input, shape index: {}]   ;;  %s1837_s12 = inlined_call_operand.vmem [shape: f32[16,48], index: 12, kind: input, shape index: {}]   ;;  %s1838_s13 = inlined_call_operand.vmem [shape: f32[16,1], index: 13, kind: input, shape index: {}]   ;;  %s1839_s14 = inlined_call_operand.vmem [shape: f32[16,1], index: 14, kind: input, shape index: {}]   ;;  %s1840_s15 = inlined_call_operand.vmem [shape: f32[16,256], index: 15, kind: output, shape index: {}]  }
   0x1   :  { %s1654_s20 = smov 0  }
   0x2 LB: > { %s1663_s21 = sadd.s32 4294967295, %s1561_s20   ;;  %s1665_s22 = sadd.s32 1, %s1561_s20   ;;  %s1561_s20 = sphi %s1654_s20, %s1848_s20   ;;  %s1557_s19 = sphi %s1652_s19, %s1847_s19   ;;  %s1553_s18 = sphi %s1650_s18, %s1846_s18  }
   0x3   : > { %s354_s23 = ssub.s32 %s1561_s20, %s1665_s22  ;;  %s357_s24 = sadd.s32 1, %s1557_s19 }
   0x4   : > { %p355_p0 = scmp.eq.s32.totalorder %s354_s23, 0  ;;  %p367_p1 = scmp.ne.s32.totalorder %s1557_s19, %s1553_s18 }
   0x5   : > { %p368_p2 = scmp.eq.s32.totalorder %s1663_s21, 1  ;;  %p1327_p3 = scmp.ge.s32.totalorder %s1561_s20, 1 }
   0x6   : > { %s1673_s25 = scalar_select %p355_p0, %s1557_s19, %s357_s24  }
   0x7   : > { %p1675_p4 = por %p368_p2, %p367_p1  ;;  %p445_p5 = scmp.lt.s32.totalorder %s1561_s20, 3 }
   0x8   : > { %1841 = sst [smem:[#allocation3_spill]] %s1673_s25 }
   0x9   : > { %p446_p6 = pnand %p1327_p3, %p445_p5 }
   0xa   : > { %p495_p7 = scmp.lt.s32.totalorder (!%p446_p6), %s1663_s21, 1  ;;  %v1563_v0 = vmov (!%p446_p6), 0.0|0.0   ;;  %vm1564_vm0 = vmmov (!%p446_p6), 0   ;;  %v1565_v1 = vmov (!%p446_p6), 0.0   ;;  %s1566_s24 = smov (!%p446_p6), 1   ;;  %v503_v5 = vlaneseq (!%p446_p6)  ;;  %v519_v11 = vld [vmem:[%s1828_s3] sm:$0xff] (!%p446_p6) }
   0xb   : > { %449 = sbr.rel (%p446_p6) target bundleno = 2598 (0xa26), region = 80  ;;  %1426 = vmatprep.subr.bf16.mxu0 (!%p446_p6), %v1563_v0  ;;  %1430 = vmatprep.subr.bf16.mxu1 (!%p446_p6), %v1563_v0  ;;  %s1567_s25 = smov (!%p446_p6), 127   ;;  %vm1568_vm2 = vmmov (!%p446_p6), 1   ;;  %vm530_vm5 = vcmask (!%p446_p6), 195584   ;;  %v1569_v15 = vmov (!%p446_p6), 0   ;;  %v635_v16 = vld [vmem:[%s1829_s4] sm:$0xff] (!%p446_p6) }
   0xc   : > { %1385 = vmatprep.mubr.msk.f32.mxu0 (!%p446_p6), %vm1564_vm0, %v1565_v1  ;;  %1394 = vmatprep.mubr.msk.f32.mxu1 (!%p446_p6), %vm1564_vm0, %v1565_v1  ;;  %v1696_v6 = vand.u32 (!%p446_p6), 127, %v503_v5  ;;  %v642_v17 = vld [vmem:[%s1830_s5] sm:$0xff] (!%p446_p6)  ;;  %vm978_vm6 = vcmask (!%p446_p6), 392192   ;;  %vm1126_vm9 = vcmask (!%p446_p6), 15360   ;;  %vm1133_vm10 = vcmask (!%p446_p6), 1041408  }
   0xd   : > { %1511 = vset.pattern.permute.xlu0 (!%p446_p6), %v1569_v15  ;;  %1512 = vset.pattern.permute.xlu1 (!%p446_p6), %v1569_v15  ;;  %v658_v53 = vld [vmem:[%s1831_s6] sm:$0xff] (!%p446_p6) }
   0xe   : > { %vm506_vm1 = vcmp.ge.s32.totalorder (!%p446_p6), %v1696_v6, 1  ;;  %vm507_vm4 = vcmp.lt.s32.totalorder (!%p446_p6), %v1696_v6, 127  ;;  %v776_v58 = vld [vmem:[%s1833_s8] sm:$0xff] (!%p446_p6) }
   0xf   : > { %vm1701_vm3 = vmpackc.low (!%p446_p6), %vm1568_vm2, %vm506_vm1  ;;  %v769_v59 = vld [vmem:[%s1832_s7] sm:$0xff] (!%p446_p6) }
  0x10   : > { %vm1441_vm7 = vmpackc.low (!%p446_p6), %vm506_vm1, %vm506_vm1 }
  0x11   : > { %vm1451_vm8 = vmpackc.low (!%p446_p6), %vm507_vm4, %vm507_vm4 }
  0x12   : > { %s496_s27 = scalar_select %p495_p7, %s1663_s21, 1 }
  0x14   : > { %s1329_s28 = sshll.u32 %s496_s27, 3 }
  0x15   : > { %s498_s16 = scalar_lea.vmem %s1825_s0, %s1329_s28  ;;  %s502_s23 = scalar_lea.vmem %s1826_s1, %s1329_s28 }
  0x16   : > { %v516_v2 = vld [vmem:[%s498_s16] sm:$0xff] }
  0x17   : > { %v517_v3 = vld [vmem:[%s502_s23] sm:$0xff] }
  0x18   : > { %v1689_v4 = vmax.f32 %v516_v2, %v517_v3 }
  0x1a   : > { %520 = vrot.lane.b32.xlu0 %v1689_v4, %s1566_s24 }
  0x1e   : > { %525 = vrot.lane.b32.xlu0 %v1689_v4, %s1567_s25 }
  0x22   : > { %638 = vperm.xlu0 %1511, %v635_v16  }
  0x8c   : > { %v521_v7 = vpop.permute.xlu0 %520 }
  0x8d   : > { %v1427_v9 = vpack.c.bf16 %v1689_v4, %v521_v7 }
  0x8f   : > { %1429 = vmatpush3.bf16.msk.msra.mxu0 %vm1701_vm3, %v1427_v9 }
  0x90   : > { %1383 = vmatprep.subr.mxu0 %v1565_v1  ;;  %v526_v10 = vpop.permute.xlu0 %525 }
  0x93   : > { %1384 = vmatpush3.msk.msra.mxu0 %vm507_vm4, %v526_v10 }
  0x94   : > { %1386 = vmatmul.mubr.msk.f32.vlgmr.msra.gmra.mrb[0].mxu0 %vm530_vm5, %v519_v11 }
  0xa1   : > { %v639_v37 = vpop.permute.xlu0 %638 }
 0x167   : > { %v600_v12 = vpop.f32.mrb[0].mxu0 }
 0x168   : > { %604 = vadd.xlane.f32.xlu1 %v600_v12  ;;  %v1387_v13 = vpop.f32.mrb[1].mxu0  ;;  %v614_v14 = vmul.f32 %v600_v12, %v600_v12 }
 0x16c   : > { %615 = vadd.xlane.f32.xlu1 %v614_v14 }
 0x17d   : > { %645 = vperm.xlu1 %1512, %v642_v17  }
 0x1f5   : > { %v605_v18 = vpop.xlane.xlu1 %604 }
 0x1f6   : > { %v606_v19 = vrot.slane %v605_v18, 4 }
 0x1f8   : > { %v607_v20 = vadd.f32 %v606_v19, %v605_v18 }
 0x1f9   : > { %v616_v21 = vpop.xlane.xlu1 %615 }
 0x1fa   : > { %v608_v22 = vrot.slane %v607_v20, 2  ;;  %v617_v23 = vrot.slane %v616_v21, 4 }
 0x1fc   : > { %v618_v24 = vadd.f32 %v617_v23, %v616_v21  ;;  %v609_v25 = vadd.f32 %v608_v22, %v607_v20 }
 0x1fd   : > { %v646_v39 = vpop.permute.xlu1 %645 }
 0x1fe   : > { %v619_v26 = vrot.slane %v618_v24, 2  ;;  %v610_v27 = vrot.slane %v609_v25, 1 }
 0x200   : > { %v611_v28 = vadd.f32 %v610_v27, %v609_v25  ;;  %v620_v29 = vadd.f32 %v619_v26, %v618_v24 }
 0x202   : > { %1456 = vpush %v611_v28  ;;  %v621_v30 = vrot.slane %v620_v29, 1 }
 0x204   : > { %v622_v31 = vadd.f32 %v621_v30, %v620_v29 }
 0x206   : > { %1458 = vpush %v622_v31  ;;  %v793_v31 = vld [vmem:[%s1834_s9] sm:$0xff] }
 0x207   : > { %1403 = vmatprep.mubr.msk.f32.mxu0 %vm530_vm5, %v793_v31 }
 0x233   : > { %s1457_s20 = spop %1456 }
 0x234   : > { %s613_s23 = smul.f32 0.0009765625, %s1457_s20 }
 0x236   : > { %v627_v32 = vstv %s613_s23  ;;  %s625_s27 = smul.f32 %s613_s23, %s613_s23 }
 0x237   : > { %s1459_s28 = spop %1458  ;;  %v628_v33 = vsub.f32 %v600_v12, %v627_v32 }
 0x238   : > { %s624_s29 = smul.f32 0.0009765625, %s1459_s28 }
 0x23a   : > { %s626_s30 = ssub.f32 %s624_s29, %s625_s27 }
 0x23c   : > { %s629_s16 = sadd.f32 1e-05, %s626_s30 }
 0x23e   : > { %v630_v34 = vstv %s629_s16 }
 0x23f   : > { %1523 = vrsqrt.f32 %v630_v34 }
 0x249   : > { %v1524_v35 = vpop.eup %1523 }
 0x24a   : > { %1460 = vpush %v1524_v35 }
 0x27b   : > { %s1461_s17 = spop %1460 }
 0x27c   : > { %v633_v36 = vstv %s1461_s17 }
 0x27d   : > { %v634_v38 = vmul.f32 %v633_v36, %v628_v33 }
 0x27f   : > { %v641_v40 = vmul.f32 %v639_v37, %v634_v38  ;;  %v794_v38 = vld [vmem:[%s1834_s9 + $0x8] sm:$0xff] }
 0x281   : > { %v648_v41 = vadd.f32 %v646_v39, %v641_v40 }
 0x283   : > { %v650_v42 = vmul.f32 0.044715, %v648_v41  ;;  %v649_v48 = vmul.f32 0.5, %v648_v41 }
 0x285   : > { %v651_v43 = vmul.f32 %v650_v42, %v648_v41 }
 0x287   : > { %v652_v44 = vmul.f32 %v651_v43, %v648_v41 }
 0x289   : > { %v653_v45 = vadd.f32 %v652_v44, %v648_v41  ;;  %v919_v44 = vld [vmem:[%s1835_s10 + $0x8] sm:$0xff] }
 0x28b   : > { %v654_v46 = vmul.f32 0.7978846, %v653_v45  ;;  %v918_v45 = vld [vmem:[%s1835_s10] sm:$0xff] }
 0x28d   : > { %1525 = vtanh.f32 %v654_v46  ;;  %v933_v46 = vld [vmem:[%s1836_s11 + $0x8] sm:$0xff] }
 0x297   : > { %v1526_v47 = vpop.eup %1525 }
 0x298   : > { %v656_v49 = vadd.f32 1.0, %v1526_v47  ;;  %v932_v47 = vld [vmem:[%s1836_s11] sm:$0xff] }
 0x29a   : > { %v657_v50 = vmul.f32 %v656_v49, %v649_v48 }
 0x29c   : > { %659 = vrot.lane.b32.xlu0 %v657_v50, %s1566_s24 }
 0x2a0   : > { %662 = vrot.lane.b32.xlu0 %v657_v50, %s1567_s25 }
 0x30e   : > { %v660_v51 = vpop.permute.xlu0 %659 }
 0x30f   : > { %v1431_v52 = vpack.c.bf16 %v657_v50, %v660_v51 }
 0x311   : > { %1433 = vmatpush3.bf16.msk.msra.mxu1 %vm1701_vm3, %v1431_v52 }
 0x312   : > { %1392 = vmatprep.subr.mxu1 %v1565_v1  ;;  %v663_v54 = vpop.permute.xlu0 %662 }
 0x315   : > { %1393 = vmatpush3.msk.msra.mxu1 %vm507_vm4, %v663_v54 }
 0x316   : > { %1395 = vmatmul.mubr.msk.f32.vlgmr.msra.gmra.mrb[0].mxu1 %vm530_vm5, %v658_v53 }
 0x3e9   : > { %v734_v55 = vpop.f32.mrb[0].mxu1 }
 0x3ea   : > { %738 = vadd.xlane.f32.xlu0 %v734_v55  ;;  %v1396_v56 = vpop.f32.mrb[1].mxu1  ;;  %v748_v57 = vmul.f32 %v734_v55, %v734_v55 }
 0x3ec   : > { %749 = vadd.xlane.f32.xlu1 %v748_v57 }
 0x3fd   : > { %779 = vperm.xlu1 %1512, %v776_v58  }
 0x400   : > { %772 = vperm.xlu0 %1511, %v769_v59  }
 0x477   : > { %v739_v60 = vpop.xlane.xlu0 %738 }
 0x478   : > { %v740_v61 = vrot.slane %v739_v60, 4 }
 0x479   : > { %v750_v62 = vpop.xlane.xlu1 %749 }
 0x47a   : > { %v741_v63 = vadd.f32 %v740_v61, %v739_v60  ;;  %v751_v0 = vrot.slane %v750_v62, 4 }
 0x47c   : > { %v742_v2 = vrot.slane %v741_v63, 2  ;;  %v752_v3 = vadd.f32 %v751_v0, %v750_v62 }
 0x47d   : > { %v780_v23 = vpop.permute.xlu1 %779 }
 0x47e   : > { %v753_v7 = vrot.slane %v752_v3, 2  ;;  %v743_v9 = vadd.f32 %v742_v2, %v741_v63 }
 0x47f   : > { %v773_v21 = vpop.permute.xlu0 %772 }
 0x480   : > { %v744_v10 = vrot.slane %v743_v9, 1  ;;  %v754_v11 = vadd.f32 %v753_v7, %v752_v3 }
 0x482   : > { %v745_v12 = vadd.f32 %v744_v10, %v743_v9  ;;  %v755_v13 = vrot.slane %v754_v11, 1 }
 0x484   : > { %1462 = vpush %v745_v12  ;;  %v756_v14 = vadd.f32 %v755_v13, %v754_v11 }
 0x486   : > { %1464 = vpush %v756_v14 }
 0x4b5   : > { %s1463_s16 = spop %1462 }
 0x4b6   : > { %s747_s17 = smul.f32 0.0009765625, %s1463_s16 }
 0x4b7   : > { %s1465_s20 = spop %1464 }
 0x4b8   : > { %s759_s23 = smul.f32 %s747_s17, %s747_s17  ;;  %v761_v15 = vstv %s747_s17 }
 0x4b9   : > { %s758_s27 = smul.f32 0.0009765625, %s1465_s20  ;;  %v762_v16 = vsub.f32 %v734_v55, %v761_v15 }
 0x4bb   : > { %s760_s28 = ssub.f32 %s758_s27, %s759_s23 }
 0x4bd   : > { %s763_s29 = sadd.f32 1e-05, %s760_s28 }
 0x4bf   : > { %v764_v17 = vstv %s763_s29 }
 0x4c0   : > { %1527 = vrsqrt.f32 %v764_v17 }
 0x4ca   : > { %v1528_v18 = vpop.eup %1527 }
 0x4cb   : > { %1466 = vpush %v1528_v18 }
 0x4fc   : > { %s1467_s30 = spop %1466 }
 0x4fd   : > { %v767_v19 = vstv %s1467_s30 }
 0x4fe   : > { %v768_v20 = vmul.f32 %v767_v19, %v762_v16 }
 0x500   : > { %v775_v22 = vmul.f32 %v773_v21, %v768_v20 }
 0x502   : > { %v782_v24 = vadd.f32 %v780_v23, %v775_v22 }
 0x504   : > { %v783_v25 = vadd.f32 %v782_v24, %v1689_v4 }
 0x506   : > { %v785_v26 = vmul.f32 0.044715, %v783_v25  ;;  %v784_v33 = vmul.f32 0.5, %v783_v25 }
 0x508   : > { %v786_v27 = vmul.f32 %v785_v26, %v783_v25 }
 0x50a   : > { %v787_v28 = vmul.f32 %v786_v27, %v783_v25 }
 0x50c   : > { %v788_v29 = vadd.f32 %v787_v28, %v783_v25 }
 0x50e   : > { %v789_v30 = vmul.f32 0.7978846, %v788_v29 }
 0x510   : > { %1529 = vtanh.f32 %v789_v30 }
 0x51a   : > { %v1530_v32 = vpop.eup %1529 }
 0x51b   : > { %v791_v34 = vadd.f32 1.0, %v1530_v32 }
 0x51d   : > { %v792_v35 = vmul.f32 %v791_v34, %v784_v33 }
 0x51f   : > { %798 = vrot.lane.b32.xlu1 %v792_v35, %s1567_s25  ;;  %795 = vrot.lane.b32.xlu0 %v792_v35, %s1566_s24 }
 0x591   : > { %v796_v4 = vpop.permute.xlu0 %795  ;;  %v799_v37 = vpop.permute.xlu1 %798 }
 0x592   : > { %v1434_v36 = vpack.c.bf16 %v792_v35, %v796_v4 }
 0x594   : > { %1436 = vmatprep.subr.msk.bf16.mxu0 %vm1701_vm3, %v1434_v36 }
 0x595   : > { %1439 = vmatpush3.bf16.msk.msra.mxu0 %vm1701_vm3, %v1434_v36 }
 0x596   : > { %1401 = vmatprep.subr.msk.mxu0 %vm507_vm4, %v799_v37 }
 0x599   : > { %1402 = vmatpush3.msk.msra.mxu0 %vm507_vm4, %v799_v37 }
 0x59a   : > { %1404 = vmatmul.mubr.msk.f32.vlgmr.msra.gmra.mrb[2].mxu0 %vm530_vm5, %v794_v38  ;;  %v964_v38 = vld [vmem:[%s1837_s12] sm:$0xff] }
 0x59b   : > { %1418 = vmatprep.mubr.msk.f32.mxu1 %vm978_vm6, %v964_v38 }
 0x66d   : > { %v1405_v39 = vpop.f32.mrb[2].mxu0 }
 0x66e   : > { %v873_v40 = vpop.f32.mrb[3].mxu0  ;;  %v894_v41 = vmul.f32 %v1405_v39, %v1405_v39 }
 0x66f   : > { %v882_v42 = vadd.f32 %v1405_v39, %v873_v40  ;;  %v893_v43 = vmul.f32 %v873_v40, %v873_v40 }
 0x671   : > { %883 = vadd.xlane.f32.xlu0 %v882_v42  ;;  %v895_v8 = vadd.f32 %v894_v41, %v893_v43 }
 0x673   : > { %896 = vadd.xlane.f32.xlu1 %v895_v8 }
 0x684   : > { %927 = vperm.xlu1 %1512, %v919_v44  }
 0x687   : > { %922 = vperm.xlu0 %1511, %v918_v45  }
 0x688   : > { %941 = vperm.xlu1 %1512, %v933_v46   ;;  %v965_v46 = vld [vmem:[%s1837_s12 + $0x8] sm:$0xff] }
 0x68b   : > { %936 = vperm.xlu0 %1511, %v932_v47   ;;  %v509_v47 = vshrl.u32 %v503_v5, 7 }
 0x6fe   : > { %v884_v48 = vpop.xlane.xlu0 %883 }
 0x6ff   : > { %v885_v49 = vrot.slane %v884_v48, 4 }
 0x700   : > { %v897_v50 = vpop.xlane.xlu1 %896 }
 0x701   : > { %v886_v51 = vadd.f32 %v885_v49, %v884_v48  ;;  %v898_v52 = vrot.slane %v897_v50, 4  ;;  %v510_v48 = vshra.s32 %v1696_v6, 7  ;;  %v511_v49 = vstv %s1663_s21 }
 0x703   : > { %v887_v53 = vrot.slane %v886_v51, 2  ;;  %v899_v54 = vadd.f32 %v898_v52, %v897_v50  ;;  %v1124_v50 = vld [vmem:[%s1827_s2] sm:$0xff] }
 0x704   : > { %v928_v7 = vpop.permute.xlu1 %927  ;;  %1423 = vmatprep.mubr.msk.f32.mxu0 %vm1126_vm9, %v1124_v50 }
 0x705   : > { %v900_v55 = vrot.slane %v899_v54, 2  ;;  %v888_v56 = vadd.f32 %v887_v53, %v886_v51  ;;  %v512_v51 = vadd.s32 %v511_v49, %v510_v48  ;;  %v1125_v53 = vld [vmem:[%s1827_s2 + $0x8] sm:$0xff] }
 0x706   : > { %v923_v9 = vpop.permute.xlu0 %922 }
 0x707   : > { %v889_v57 = vrot.slane %v888_v56, 1  ;;  %v901_v58 = vadd.f32 %v900_v55, %v899_v54  ;;  %vm513_vm11 = vcmp.eq.s32.totalorder %v509_v47, %v512_v51 }
 0x708   : > { %v942_v15 = vpop.permute.xlu1 %941  ;;  %v1331_v52 = vsel %vm513_vm11, 1.0, %v1565_v1  ;;  %v1096_v1 = vld [vmem:[%s1838_s13] sm:$0xff] }
 0x709   : > { %v890_v59 = vadd.f32 %v889_v57, %v888_v56  ;;  %v902_v60 = vrot.slane %v901_v58, 1  ;;  %1421 = vmatprep.subr.msk.mxu0 %vm1133_vm10, %v1331_v52 }
 0x70a   : > { %v937_v16 = vpop.permute.xlu0 %936  ;;  %1422 = vmatpush3.msk.msra.mxu0 %vm1133_vm10, %v1331_v52 }
 0x70b   : > { %1468 = vpush %v890_v59  ;;  %v903_v61 = vadd.f32 %v902_v60, %v901_v58  ;;  %1424 = vmatmul.mubr.msk.f32.vlgmr.msra.gmra.mrb[4].mxu0 %vm1126_vm9, %v1125_v53  ;;  %v1097_v58 = vld [vmem:[%s1838_s13 + $0x8] sm:$0xff]  ;;  %v1110_v60 = vld [vmem:[%s1839_s14] sm:$0xff] }
 0x70c   : > { %v1111_v59 = vld [vmem:[%s1839_s14 + $0x8] sm:$0xff] }
 0x70d   : > { %1470 = vpush %v903_v61 }
 0x73c   : > { %s1469_s27 = spop %1468 }
 0x73d   : > { %s892_s28 = smul.f32 0.00048828125, %s1469_s27 }
 0x73e   : > { %s1471_s29 = spop %1470 }
 0x73f   : > { %s906_s30 = smul.f32 %s892_s28, %s892_s28  ;;  %v908_v62 = vstv %s892_s28 }
 0x740   : > { %s905_s16 = smul.f32 0.00048828125, %s1471_s29  ;;  %v909_v63 = vsub.f32 %v873_v40, %v908_v62  ;;  %v910_v0 = vsub.f32 %v1405_v39, %v908_v62  ;;  %s492_s29 = sand.u32 1, %s1553_s18  }
 0x742   : > { %s907_s17 = ssub.f32 %s905_s16, %s906_s30  ;;  %s1328_s30 = sshll.u32 %s492_s29, 4 }
 0x744   : > { %s911_s20 = sadd.f32 1e-05, %s907_s17 }
 0x746   : > { %v912_v2 = vstv %s911_s20 }
 0x747   : > { %1531 = vrsqrt.f32 %v912_v2 }
 0x751   : > { %v1532_v3 = vpop.eup %1531 }
 0x752   : > { %1472 = vpush %v1532_v3 }
 0x783   : > { %s1473_s23 = spop %1472 }
 0x784   : > { %v915_v10 = vstv %s1473_s23 }
 0x785   : > { %v916_v11 = vmul.f32 %v915_v10, %v909_v63  ;;  %v917_v12 = vmul.f32 %v915_v10, %v910_v0 }
 0x787   : > { %v930_v13 = vmul.f32 %v923_v9, %v916_v11  ;;  %v931_v14 = vmul.f32 %v928_v7, %v917_v12 }
 0x789   : > { %v944_v17 = vadd.f32 %v937_v16, %v930_v13  ;;  %v945_v18 = vadd.f32 %v942_v15, %v931_v14 }
 0x78b   : > { %v948_v19 = vmul.f32 0.044715, %v944_v17  ;;  %v949_v20 = vmul.f32 0.044715, %v945_v18  ;;  %v946_v31 = vmul.f32 0.5, %v944_v17  ;;  %v947_v33 = vmul.f32 0.5, %v945_v18 }
 0x78d   : > { %v950_v21 = vmul.f32 %v948_v19, %v944_v17  ;;  %v951_v22 = vmul.f32 %v949_v20, %v945_v18 }
 0x78f   : > { %v952_v23 = vmul.f32 %v950_v21, %v944_v17  ;;  %v953_v24 = vmul.f32 %v951_v22, %v945_v18 }
 0x791   : > { %v954_v25 = vadd.f32 %v952_v23, %v944_v17  ;;  %v955_v26 = vadd.f32 %v953_v24, %v945_v18 }
 0x793   : > { %v956_v27 = vmul.f32 0.7978846, %v954_v25  ;;  %v957_v28 = vmul.f32 0.7978846, %v955_v26 }
 0x795   : > { %1533 = vtanh.f32 %v956_v27 }
 0x796   : > { %1535 = vtanh.f32 %v957_v28 }
 0x79f   : > { %v1534_v29 = vpop.eup %1533 }
 0x7a0   : > { %v1536_v30 = vpop.eup %1535  ;;  %v960_v32 = vadd.f32 1.0, %v1534_v29 }
 0x7a1   : > { %v961_v34 = vadd.f32 1.0, %v1536_v30 }
 0x7a2   : > { %v962_v35 = vmul.f32 %v960_v32, %v946_v31 }
 0x7a3   : > { %v963_v4 = vmul.f32 %v961_v34, %v947_v33 }
 0x7a5   : > { %v1518_v36 = vpack.i.bf16 %v963_v4, %v962_v35  ;;  %v1446_v37 = vpack.c.bf16 %v963_v4, %v962_v35 }
 0x7a7   : > { %1519 = vrot.lane.b32.xlu1 %v1518_v36, %s1567_s25  ;;  %1514 = vrot.lane.b32.xlu0 %v1518_v36, %s1566_s24 }
 0x7de   : > { %v1425_v13 = vpop.f32.mrb[4].mxu0 }
 0x7df   : > { %v1203_v16 = vpop.f32.mrb[5].mxu0 }
 0x819   : > { %v1515_v39 = vpop.permute.xlu0 %1514  ;;  %v1520_v42 = vpop.permute.xlu1 %1519 }
 0x81a   : > { %v1517_v40 = vunpack.i.h.bf16 %v1515_v39  ;;  %v1516_v41 = vunpack.i.l.bf16 %v1515_v39  ;;  %v1522_v8 = vunpack.i.h.bf16 %v1520_v42  ;;  %v1521_v44 = vunpack.i.l.bf16 %v1520_v42 }
 0x81c   : > { %v1440_v43 = vpack.c.bf16 %v1517_v40, %v1516_v41  ;;  %v1450_v45 = vpack.c.bf16 %v1522_v8, %v1521_v44 }
 0x81e   : > { %1442 = vmatprep.subr.msk.bf16.mxu1 %vm1441_vm7, %v1440_v43 }
 0x81f   : > { %1445 = vmatpush3.bf16.msk.msra.mxu1 %vm1441_vm7, %v1440_v43 }
 0x820   : > { %1447 = vmatprep.subr.bf16.mxu1 %v1446_v37 }
 0x823   : > { %1449 = vmatpush3.bf16.msra.mxu1 %v1446_v37 }
 0x824   : > { %1452 = vmatprep.subr.msk.bf16.mxu1 %vm1451_vm8, %v1450_v45 }
 0x827   : > { %1455 = vmatpush3.bf16.msk.msra.mxu1 %vm1451_vm8, %v1450_v45 }
 0x82a   : > { %1419 = vmatmul.mubr.msk.f32.vlgmr.msra.gmra.mrb[2].mxu1 %vm978_vm6, %v965_v46 }
 0x8fd   : > { %v1420_v5 = vpop.f32.mrb[2].mxu1 }
 0x8fe   : > { %v1051_v6 = vpop.f32.mrb[3].mxu1  ;;  %v1072_v54 = vmul.f32 %v1420_v5, %v1420_v5 }
 0x8ff   : > { %v1071_v55 = vmul.f32 %v1051_v6, %v1051_v6  ;;  %v1060_v56 = vadd.f32 %v1420_v5, %v1051_v6 }
 0x901   : > { %1061 = vadd.xlane.f32.xlu0 %v1060_v56  ;;  %v1073_v57 = vadd.f32 %v1072_v54, %v1071_v55 }
 0x903   : > { %1074 = vadd.xlane.f32.xlu1 %v1073_v57 }
 0x914   : > { %1105 = vperm.xlu1 %1512, %v1097_v58  }
 0x917   : > { %1100 = vperm.xlu0 %1511, %v1096_v1  }
 0x918   : > { %1119 = vperm.xlu1 %1512, %v1111_v59  }
 0x91b   : > { %1114 = vperm.xlu0 %1511, %v1110_v60  }
 0x98e   : > { %v1062_v61 = vpop.xlane.xlu0 %1061 }
 0x98f   : > { %v1063_v62 = vrot.slane %v1062_v61, 4 }
 0x990   : > { %v1075_v63 = vpop.xlane.xlu1 %1074 }
 0x991   : > { %v1064_v0 = vadd.f32 %v1063_v62, %v1062_v61  ;;  %v1076_v2 = vrot.slane %v1075_v63, 4 }
 0x993   : > { %v1065_v3 = vrot.slane %v1064_v0, 2  ;;  %v1077_v7 = vadd.f32 %v1076_v2, %v1075_v63 }
 0x994   : > { %v1106_v23 = vpop.permute.xlu1 %1105 }
 0x995   : > { %v1078_v9 = vrot.slane %v1077_v7, 2  ;;  %v1066_v10 = vadd.f32 %v1065_v3, %v1064_v0 }
 0x996   : > { %v1101_v24 = vpop.permute.xlu0 %1100 }
 0x997   : > { %v1067_v11 = vrot.slane %v1066_v10, 1  ;;  %v1079_v12 = vadd.f32 %v1078_v9, %v1077_v7 }
 0x998   : > { %v1120_v30 = vpop.permute.xlu1 %1119 }
 0x999   : > { %v1068_v14 = vadd.f32 %v1067_v11, %v1066_v10  ;;  %v1080_v15 = vrot.slane %v1079_v12, 1 }
 0x99a   : > { %v1115_v31 = vpop.permute.xlu0 %1114 }
 0x99b   : > { %1474 = vpush %v1068_v14  ;;  %v1081_v17 = vadd.f32 %v1080_v15, %v1079_v12 }
 0x99d   : > { %1476 = vpush %v1081_v17 }
 0x9cc   : > { %s1475_s16 = spop %1474 }
 0x9cd   : > { %s1070_s17 = smul.f32 0.00048828125, %s1475_s16  ;;  %s494_s16 = scalar_lea.vmem [#allocation2], %s1328_s30 }
 0x9ce   : > { %s1477_s20 = spop %1476 }
 0x9cf   : > { %s1084_s23 = smul.f32 %s1070_s17, %s1070_s17  ;;  %v1086_v18 = vstv %s1070_s17  ;;  %s1352_s17 = sshll.u32 (%p1675_p4), %s1663_s21, 3 }
 0x9d0   : > { %s1083_s27 = smul.f32 0.00048828125, %s1477_s20  ;;  %v1087_v19 = vsub.f32 %v1051_v6, %v1086_v18  ;;  %v1088_v20 = vsub.f32 %v1420_v5, %v1086_v18 }
 0x9d2   : > { %s1085_s28 = ssub.f32 %s1083_s27, %s1084_s23  ;;  %s1224_s23 = scalar_lea.vmem (%p1675_p4), %s1840_s15, %s1352_s17 }
 0x9d4   : > { %s1089_s25 = sadd.f32 1e-05, %s1085_s28 }
 0x9d6   : > { %v1090_v21 = vstv %s1089_s25 }
 0x9d7   : > { %1537 = vrsqrt.f32 %v1090_v21 }
 0x9e1   : > { %v1538_v22 = vpop.eup %1537 }
 0x9e2   : > { %1478 = vpush %v1538_v22 }
 0xa13   : > { %s1479_s24 = spop %1478 }
 0xa14   : > { %v1093_v25 = vstv %s1479_s24 }
 0xa15   : > { %v1094_v26 = vmul.f32 %v1093_v25, %v1087_v19  ;;  %v1095_v27 = vmul.f32 %v1093_v25, %v1088_v20 }
 0xa17   : > { %v1108_v28 = vmul.f32 %v1101_v24, %v1094_v26  ;;  %v1109_v29 = vmul.f32 %v1106_v23, %v1095_v27  ;;  %1222 = sbr.rel (!%p1675_p4) target bundleno = 2598 (0xa26), region = 84 }
 0xa19   : > { %v1123_v32 = vadd.f32 %v1120_v30, %v1109_v29  ;;  %v1122_v33 = vadd.f32 %v1115_v31, %v1108_v28 }
 0xa1b   : > { %v1213_v34 = vadd.f32 %v1425_v13, %v1123_v32  ;;  %v1212_v35 = vadd.f32 %v1203_v16, %v1122_v33 }
 0xa1d   : > { %1215 = vst [vmem:[%s494_s16 + $0x8] sm:$0xff] %v1213_v34  ;;  %1214 = vst [vmem:[%s494_s16] sm:$0xff] %v1212_v35 }
 0xa24   : > { %v1254_v4 = vld [vmem:[%s494_s16] sm:$0xff]  ;;  %v1256_v36 = vld [vmem:[%s494_s16 + $0x8] sm:$0xff] }
 0xa25   : > { %1255 = vst [vmem:[%s1224_s23] sm:$0xff] %v1254_v4  ;;  %1257 = vst [vmem:[%s1224_s23 + $0x10] sm:$0xff] %v1256_v36 }
 0xa26 PF: > { %s1845_s27 = sld [smem:[#allocation3_spill]]  ;;  %p22_p8 = scmp.ge.s32.totalorder %s1665_s22, 4  }
 0xa27   : > { %s1846_s18 = smov %s1557_s19  ;;  %s1848_s20 = smov %s1665_s22 }
 0xa28   :  { %24 = sbr.rel (!%p22_p8) target bundleno = 2 (0x2), region = 151 }
 0xa2c   : > { %s1847_s19 = smov %s1845_s27 }

</bundles_post_ra>
